<compile_context>
chip_gen: v5e
topology: v5e:2x2
jax: 0.10.0
libtpu: 0.0.40
codegen_flags: <defaults>
</compile_context>

<pallas_src>
import jax
import jax.numpy as jnp
from jax.experimental import pallas as pl
from jax.experimental.pallas import tpu as pltpu

LANE = 128
SUBLANE = 8


def _round_up(x, m):
    return pl.cdiv(x, m) * m


# ----------------------------------------------------------------------------
# Kernel: fused (1x1 conv [BN scale folded]) + bias (BN shift) + ReLU
# ----------------------------------------------------------------------------
def conv_bn_relu_kernel(x_ref, w_ref, b_ref, o_ref):
    # x_ref: [tm, Cin_p]  bf16 (activations, channels on the lane axis)
    # w_ref: [Cin_p, Cout_p] bf16 (conv weight with BN scale folded in)
    # b_ref: [1, Cout_p]  f32  (BN shift)
    # o_ref: [tm, Cout_p] output dtype
    acc = jnp.dot(x_ref[...], w_ref[...], preferred_element_type=jnp.float32)
    acc = acc + b_ref[...]
    o_ref[...] = jnp.maximum(acc, 0.0).astype(o_ref.dtype)


# ----------------------------------------------------------------------------
# Wrapper
# ----------------------------------------------------------------------------
def conv4_forward(x, weight, gamma, beta, running_mean, running_var,
                  *, eps=1e-5, tm=None, compute_dtype=jnp.bfloat16):
    """x: [B, Cin, H, W] (NCHW, like PyTorch) -> [B, Cout, H, W].

    BatchNorm is applied in inference mode (running statistics).
    """
    # TODO(synk): training-mode BatchNorm (batch statistics of the conv output)
    # would need an extra cross-tile reduction pass; inference semantics only.
    B, Cin, H, W = x.shape
    Cout = weight.shape[0]
    w2d = weight.reshape(Cout, Cin).astype(jnp.float32)

    # Fold BN (eval) into the bias-free 1x1 conv:  y = x @ (Wt*scale) + shift
    inv_std = jax.lax.rsqrt(running_var.astype(jnp.float32) + eps)
    scale = gamma.astype(jnp.float32) * inv_std                         # [Cout]
    shift = beta.astype(jnp.float32) - running_mean.astype(jnp.float32) * scale
    w_folded = (w2d * scale[:, None]).T                                 # [Cin, Cout]

    # channels-last rows for the matmul
    x_rows = jnp.transpose(x, (0, 2, 3, 1)).reshape(-1, Cin)            # [M, Cin]
    M = x_rows.shape[0]

    # lane-dense padding of the feature dims (multiples of 128)
    Cin_p = _round_up(Cin, LANE)
    Cout_p = _round_up(Cout, LANE)

    # Row tile: as large as a ~12 MiB double-buffered x/out budget allows
    # (whole M in one grid step when it fits), capped at 1024 rows.
    if tm is None:
        per_row = 2 * (Cin_p * 2 + Cout_p * 4)      # bf16 in + f32 out, x2 buffers
        tm = max(SUBLANE, min(_round_up(M, SUBLANE),
                              (12 * 1024 * 1024) // per_row))
        tm = min((tm // SUBLANE) * SUBLANE, 1024)
    M_p = _round_up(M, tm)

    # zero-pad rows and channels; feed the MXU bf16 operands
    x_p = jnp.zeros((M_p, Cin_p), compute_dtype).at[:M, :Cin].set(
        x_rows.astype(compute_dtype))
    w_p = jnp.zeros((Cin_p, Cout_p), compute_dtype).at[:Cin, :Cout].set(
        w_folded.astype(compute_dtype))
    b_p = jnp.zeros((1, Cout_p), jnp.float32).at[0, :Cout].set(shift)

    grid = (M_p // tm,)

    # VMEM estimate: double-buffered x/out tiles + (double-buffered) resident
    # weights/bias.
    # TODO(synk): weights could be single-buffered (pipeline_mode=pl.Buffered(1))
    # since their block index is constant; footprint here is tiny so defaults OK.
    vmem_est = (2 * tm * Cin_p * 2 + 2 * tm * Cout_p * 4
                + 2 * Cin_p * Cout_p * 2 + 2 * Cout_p * 4)
    vmem_limit = int(min(max(vmem_est + (2 << 20), 8 << 20), 32 << 20))

    out = pl.pallas_call(
        conv_bn_relu_kernel,
        out_shape=jax.ShapeDtypeStruct((M_p, Cout_p), x.dtype),
        grid_spec=pltpu.PrefetchScalarGridSpec(
            num_scalar_prefetch=0,
            grid=grid,
            in_specs=[
                pl.BlockSpec((tm, Cin_p), lambda i: (i, 0)),
                pl.BlockSpec((Cin_p, Cout_p), lambda i: (0, 0)),
                pl.BlockSpec((1, Cout_p), lambda i: (0, 0)),
            ],
            out_specs=pl.BlockSpec((tm, Cout_p), lambda i: (i, 0)),
        ),
        compiler_params=pltpu.CompilerParams(
            dimension_semantics=("parallel",),
            vmem_limit_bytes=vmem_limit,
        ),
    )(x_p, w_p, b_p)

    out = out[:M, :Cout].reshape(B, H, W, Cout)
    return jnp.transpose(out, (0, 3, 1, 2))


# ----------------------------------------------------------------------------
# Demo / self-test
# ----------------------------------------------------------------------------
if __name__ == "__main__":
    B, Cin, Hh, Ww = 2, 4, 16, 16     # x: [batch, inplane, H, W]
    Cout = 8                          # outplane

    key = jax.random.PRNGKey(0)
    kx, kw, kg, kb, km, kv = jax.random.split(key, 6)
    x = jax.random.normal(kx, (B, Cin, Hh, Ww), jnp.float32)
    weight = jax.random.normal(kw, (Cout, Cin, 1, 1), jnp.float32) / (Cin ** 0.5)
    gamma = 1.0 + 0.1 * jax.random.normal(kg, (Cout,), jnp.float32)
    beta = 0.1 * jax.random.normal(kb, (Cout,), jnp.float32)
    running_mean = 0.1 * jax.random.normal(km, (Cout,), jnp.float32)
    running_var = jnp.abs(1.0 + 0.1 * jax.random.normal(kv, (Cout,), jnp.float32))

    y = conv4_forward(x, weight, gamma, beta, running_mean, running_var)
    y = jax.block_until_ready(y)

    # pure-JAX f32 reference:
    # 1x1 conv (no bias) -> BatchNorm2d (eval) -> ReLU -> MaxPool2d(1,1)=identity
    w2d = weight.reshape(Cout, Cin)
    conv = jnp.einsum('bchw,oc->bohw', x, w2d)
    inv_std = 1.0 / jnp.sqrt(running_var + 1e-5)
    bn = (conv - running_mean[None, :, None, None]) \
         * (gamma * inv_std)[None, :, None, None] + beta[None, :, None, None]
    y_ref = jnp.maximum(bn, 0.0)

    assert y.shape == (B, Cout, Hh, Ww)
    max_err = jnp.max(jnp.abs(y - y_ref))
    assert jnp.allclose(y, y_ref, atol=3e-2, rtol=3e-2), f"max abs err {max_err}"

    print("KERNEL_OK")
</pallas_src>

<mosaic_0001>
module attributes {stable_mosaic.version = 11 : i64} {
  func.func @conv_bn_relu_kernel(%arg0: i32, %arg1: memref<512x128xbf16, #tpu.memory_space<vmem>>, %arg2: memref<128x128xbf16, #tpu.memory_space<vmem>>, %arg3: memref<1x128xf32, #tpu.memory_space<vmem>>, %arg4: memref<512x128xf32, #tpu.memory_space<vmem>>) attributes {dimension_semantics = [#tpu.dimension_semantics<parallel>], iteration_bounds = array<i64: 1>, scalar_prefetch = 0 : i64, scratch_operands = 0 : i64, tpu.core_type = #tpu.core_type<tc>, window_params = [{transform_indices = @transform_0, window_bounds = array<i64: 512, 128>}, {pipeline_mode = #tpu.pipeline_mode<synchronous>, transform_indices = @transform_1, window_bounds = array<i64: 128, 128>}, {pipeline_mode = #tpu.pipeline_mode<synchronous>, transform_indices = @transform_2, window_bounds = array<i64: 1, 128>}, {transform_indices = @transform_3, window_bounds = array<i64: 512, 128>}]} {
    %c0 = arith.constant 0 : index
    %c0_0 = arith.constant 0 : index
    %0 = vector.load %arg1[%c0, %c0_0] : memref<512x128xbf16, #tpu.memory_space<vmem>>, vector<512x128xbf16>
    %c0_1 = arith.constant 0 : index
    %c0_2 = arith.constant 0 : index
    %1 = vector.load %arg2[%c0_1, %c0_2] : memref<128x128xbf16, #tpu.memory_space<vmem>>, vector<128x128xbf16>
    %cst = arith.constant dense<0.000000e+00> : vector<512x128xf32>
    %2 = tpu.matmul %0, %1, %cst {dimension_numbers = #tpu.dot_dimension_numbers<[1], [0], [0], [1], [0, 0, 1, 1], [], []>} : vector<512x128xbf16>, vector<128x128xbf16>, vector<512x128xf32> -> vector<512x128xf32>
    %c0_3 = arith.constant 0 : index
    %c0_4 = arith.constant 0 : index
    %3 = vector.load %arg3[%c0_3, %c0_4] : memref<1x128xf32, #tpu.memory_space<vmem>>, vector<1x128xf32>
    %4 = vector.broadcast %3 : vector<1x128xf32> to vector<512x128xf32>
    %5 = arith.addf %2, %4 : vector<512x128xf32>
    %cst_5 = arith.constant 0.000000e+00 : f32
    %6 = vector.broadcast %cst_5 : f32 to vector<512x128xf32>
    %7 = arith.maximumf %5, %6 : vector<512x128xf32>
    %c0_6 = arith.constant 0 : index
    %c0_7 = arith.constant 0 : index
    %8 = vector.load %arg4[%c0_6, %c0_7] : memref<512x128xf32, #tpu.memory_space<vmem>>, vector<512x128xf32>
    tpu.vector_store %arg4[%c0_6, %c0_7], %7 {strides = array<i32>} : memref<512x128xf32, #tpu.memory_space<vmem>>, vector<512x128xf32>,
    return
  }
  func.func @transform_0(%arg0: i32) -> (i32, i32) {
    %c0_i32 = arith.constant 0 : i32
    %c0_i32_0 = arith.constant 0 : i32
    return %arg0, %c0_i32 : i32, i32
  }
  func.func @transform_1(%arg0: i32) -> (i32, i32) {
    %c0_i32 = arith.constant 0 : i32
    %c0_i32_0 = arith.constant 0 : i32
    %c0_i32_1 = arith.constant 0 : i32
    return %c0_i32, %c0_i32_0 : i32, i32
  }
  func.func @transform_2(%arg0: i32) -> (i32, i32) {
    %c0_i32 = arith.constant 0 : i32
    %c0_i32_0 = arith.constant 0 : i32
    %c0_i32_1 = arith.constant 0 : i32
    return %c0_i32, %c0_i32_0 : i32, i32
  }
  func.func @transform_3(%arg0: i32) -> (i32, i32) {
    %c0_i32 = arith.constant 0 : i32
    %c0_i32_0 = arith.constant 0 : i32
    return %arg0, %c0_i32 : i32, i32
  }
}

</mosaic_0001>

<bundles_post_ra>
// kernel: tpu_custom_call.1
= control target key start
LH: loop header
LB: loop body
LE: loop exit
PB: predicated region body
PF: predicated region fallthrough
CT: control target
= control target key end

     0   :  { %8 = vsyncpa [#allocation3], 0  ;;  %s1103_s0 = inlined_call_operand.hbm [shape: bf16[512,128], index: 0, kind: input, shape index: {}]   ;;  %s1104_s1 = inlined_call_operand.hbm [shape: bf16[128,128], index: 1, kind: input, shape index: {}]   ;;  %s1105_s2 = inlined_call_operand.vmem [shape: f32[1,128], index: 2, kind: input, shape index: {}]   ;;  %s1106_s3 = inlined_call_operand.hbm [shape: f32[512,128], index: 3, kind: output, shape index: {}]  }
   0x1   :  { %9 = vsyncpa [#allocation6], 0 }
   0x2   :  { %10 = vsyncpa [#allocation4], 0  ;;  %s15_s14 = sshll.u32 %s1103_s0, 4  ;;  %s998_s15 = smov [#allocation2]   ;;  %s16_s14 = int_to_ptr.hbm [resolvable:$true] %s15_s14 }
   0x3   :  { %s17_s16 = sshll.u32 %s998_s15, 4  ;;  %s28_s19 = sshll.u32 %s1104_s1, 4  ;;  %s18_s16 = int_to_ptr.vmem [resolvable:$true] %s17_s16  ;;  %s29_s19 = int_to_ptr.hbm [resolvable:$true] %s28_s19 }
   0x4   :  { %s999_s20 = smov 64   ;;  %s1000_s21 = smov 4  }
   0x5   :  { %23 = dma.hbm_to_vmem [thread:$0]  %s16_s14, 4096, %s18_s16, [#allocation3], %s999_s20, %s999_s20, %s1000_s21  }
   0x6   :  { %s1001_s22 = smov [#allocation5]  }
   0x7   :  { %s30_s23 = sshll.u32 %s1001_s22, 4  ;;  %s31_s23 = int_to_ptr.vmem [resolvable:$true] %s30_s23 }
   0x8   :  { %36 = dma.hbm_to_vmem [thread:$0]  %s29_s19, 1024, %s31_s23, [#allocation6], %s999_s20, %s999_s20, %s1000_s21  }
   0x9   :  { %992 = dma.done.wait [#allocation3], 4096  }
   0xa   :  { %993 = vsyncadd [#allocation3], 4294963200 }
   0xb   :  { %994 = dma.done.wait [#allocation6], 1024  }
   0xc   :  { %995 = vsyncadd [#allocation6], 4294966272  ;;  %v887_v0 = vld [vmem:[#allocation5 + $0x38] sm:$0xff]  ;;  %v886_v1 = vld [vmem:[#allocation5 + $0x30] sm:$0xff]  ;;  %s674_s27 = sshll.u32 %s1106_s3, 4  ;;  %s1003_s28 = smov 128   ;;  %s675_s27 = int_to_ptr.hbm [resolvable:$true] %s674_s27 }
   0xd   :  { %371 = vmatpush.bf16.msra.mxu0 %v887_v0  ;;  %888 = vmatpush.bf16.msra.mxu1 %v887_v0  ;;  %v885_v2 = vld [vmem:[#allocation5 + $0x28] sm:$0xff]  ;;  %v884_v3 = vld [vmem:[#allocation5 + $0x20] sm:$0xff]  ;;  %v883_v4 = vld [vmem:[#allocation5 + $0x18] sm:$0xff]  ;;  %s1004_s29 = smov 8  }
   0xe   :  { %889 = vmatpush.bf16.msra.mxu2 %v887_v0  ;;  %890 = vmatpush.bf16.msra.mxu3 %v887_v0  ;;  %v882_v5 = vld [vmem:[#allocation5 + $0x10] sm:$0xff]  ;;  %v881_v6 = vld [vmem:[#allocation5 + $0x8] sm:$0xff]  ;;  %v880_v7 = vld [vmem:[#allocation5] sm:$0xff] }
   0xf   :  { %v848_v8 = vld [vmem:[#allocation2] sm:$0xff]  ;;  %v849_v12 = vld [vmem:[#allocation2 + $0x8] sm:$0xff]  ;;  %v850_v16 = vld [vmem:[#allocation2 + $0x10] sm:$0xff] }
  0x10   :  { %v856_v9 = vld [vmem:[#allocation2 + $0x40] sm:$0xff]  ;;  %v857_v13 = vld [vmem:[#allocation2 + $0x48] sm:$0xff]  ;;  %v858_v17 = vld [vmem:[#allocation2 + $0x50] sm:$0xff] }
  0x11   :  { %372 = vmatpush.bf16.msra.mxu0 %v886_v1  ;;  %891 = vmatpush.bf16.msra.mxu1 %v886_v1  ;;  %v864_v10 = vld [vmem:[#allocation2 + $0x80] sm:$0xff]  ;;  %v865_v14 = vld [vmem:[#allocation2 + $0x88] sm:$0xff]  ;;  %v866_v18 = vld [vmem:[#allocation2 + $0x90] sm:$0xff] }
  0x12   :  { %892 = vmatpush.bf16.msra.mxu2 %v886_v1  ;;  %893 = vmatpush.bf16.msra.mxu3 %v886_v1  ;;  %v872_v11 = vld [vmem:[#allocation2 + $0xc0] sm:$0xff]  ;;  %v873_v15 = vld [vmem:[#allocation2 + $0xc8] sm:$0xff]  ;;  %v874_v19 = vld [vmem:[#allocation2 + $0xd0] sm:$0xff] }
  0x13   :  { %v851_v20 = vld [vmem:[#allocation2 + $0x18] sm:$0xff]  ;;  %v852_v24 = vld [vmem:[#allocation2 + $0x20] sm:$0xff]  ;;  %v853_v28 = vld [vmem:[#allocation2 + $0x28] sm:$0xff] }
  0x14   :  { %v859_v21 = vld [vmem:[#allocation2 + $0x58] sm:$0xff]  ;;  %v860_v25 = vld [vmem:[#allocation2 + $0x60] sm:$0xff]  ;;  %v861_v29 = vld [vmem:[#allocation2 + $0x68] sm:$0xff] }
  0x15   :  { %373 = vmatpush.bf16.msra.mxu0 %v885_v2  ;;  %894 = vmatpush.bf16.msra.mxu1 %v885_v2  ;;  %v867_v22 = vld [vmem:[#allocation2 + $0x98] sm:$0xff]  ;;  %v868_v26 = vld [vmem:[#allocation2 + $0xa0] sm:$0xff]  ;;  %v869_v30 = vld [vmem:[#allocation2 + $0xa8] sm:$0xff] }
  0x16   :  { %895 = vmatpush.bf16.msra.mxu2 %v885_v2  ;;  %896 = vmatpush.bf16.msra.mxu3 %v885_v2  ;;  %v875_v23 = vld [vmem:[#allocation2 + $0xd8] sm:$0xff]  ;;  %v876_v27 = vld [vmem:[#allocation2 + $0xe0] sm:$0xff]  ;;  %v877_v31 = vld [vmem:[#allocation2 + $0xe8] sm:$0xff] }
  0x17   :  { %v854_v32 = vld [vmem:[#allocation2 + $0x30] sm:$0xff]  ;;  %v855_v36 = vld [vmem:[#allocation2 + $0x38] sm:$0xff]  ;;  %v1034_v40 = vld [vmem:[%s1105_s2] ss:$0 sm:$0xff]  ;;  %s1002_s2 = smov [#allocation7]  }
  0x18   :  { %v862_v33 = vld [vmem:[#allocation2 + $0x70] sm:$0xff]  ;;  %v863_v37 = vld [vmem:[#allocation2 + $0x78] sm:$0xff]  ;;  %s672_s24 = sshll.u32 %s1002_s2, 4  ;;  %s673_s24 = int_to_ptr.vmem [resolvable:$true] %s672_s24 }
  0x19   :  { %374 = vmatpush.bf16.msra.mxu0 %v884_v3  ;;  %897 = vmatpush.bf16.msra.mxu1 %v884_v3  ;;  %v870_v34 = vld [vmem:[#allocation2 + $0xb0] sm:$0xff]  ;;  %v871_v38 = vld [vmem:[#allocation2 + $0xb8] sm:$0xff] }
  0x1a   :  { %898 = vmatpush.bf16.msra.mxu2 %v884_v3  ;;  %899 = vmatpush.bf16.msra.mxu3 %v884_v3  ;;  %v878_v35 = vld [vmem:[#allocation2 + $0xf0] sm:$0xff]  ;;  %v879_v39 = vld [vmem:[#allocation2 + $0xf8] sm:$0xff] }
  0x1d   :  { %375 = vmatpush.bf16.msra.mxu0 %v883_v4  ;;  %900 = vmatpush.bf16.msra.mxu1 %v883_v4 }
  0x1e   :  { %901 = vmatpush.bf16.msra.mxu2 %v883_v4  ;;  %902 = vmatpush.bf16.msra.mxu3 %v883_v4 }
  0x21   :  { %376 = vmatpush.bf16.msra.mxu0 %v882_v5  ;;  %903 = vmatpush.bf16.msra.mxu1 %v882_v5 }
  0x22   :  { %904 = vmatpush.bf16.msra.mxu2 %v882_v5  ;;  %905 = vmatpush.bf16.msra.mxu3 %v882_v5 }
  0x25   :  { %377 = vmatpush.bf16.msra.mxu0 %v881_v6  ;;  %906 = vmatpush.bf16.msra.mxu1 %v881_v6 }
  0x26   :  { %907 = vmatpush.bf16.msra.mxu2 %v881_v6  ;;  %908 = vmatpush.bf16.msra.mxu3 %v881_v6 }
  0x29   :  { %378 = vmatpush.bf16.msra.mxu0 %v880_v7  ;;  %909 = vmatpush.bf16.msra.mxu1 %v880_v7 }
  0x2a   :  { %910 = vmatpush.bf16.msra.mxu2 %v880_v7  ;;  %911 = vmatpush.bf16.msra.mxu3 %v880_v7 }
  0x2c   :  { %379 = vmatmul.bf16.vlgmr.msra.gmra.mxu0 %v848_v8  ;;  %419 = vmatmul.bf16.vlgmr.msra.gmra.mxu1 %v856_v9 }
  0x2d   :  { %459 = vmatmul.bf16.vlgmr.msra.gmra.mxu2 %v864_v10  ;;  %499 = vmatmul.bf16.vlgmr.msra.gmra.mxu3 %v872_v11 }
  0x3c   :  { %384 = vmatmul.bf16.gmra.mxu0 %v849_v12  ;;  %424 = vmatmul.bf16.gmra.mxu1 %v857_v13 }
  0x3d   :  { %464 = vmatmul.bf16.gmra.mxu2 %v865_v14  ;;  %504 = vmatmul.bf16.gmra.mxu3 %v873_v15 }
  0x4c   :  { %389 = vmatmul.bf16.gmra.mxu0 %v850_v16  ;;  %429 = vmatmul.bf16.gmra.mxu1 %v858_v17 }
  0x4d   :  { %469 = vmatmul.bf16.gmra.mxu2 %v866_v18  ;;  %509 = vmatmul.bf16.gmra.mxu3 %v874_v19 }
  0x5c   :  { %394 = vmatmul.bf16.gmra.mxu0 %v851_v20  ;;  %434 = vmatmul.bf16.gmra.mxu1 %v859_v21 }
  0x5d   :  { %474 = vmatmul.bf16.gmra.mxu2 %v867_v22  ;;  %514 = vmatmul.bf16.gmra.mxu3 %v875_v23 }
  0x6c   :  { %399 = vmatmul.bf16.gmra.mxu0 %v852_v24  ;;  %439 = vmatmul.bf16.gmra.mxu1 %v860_v25 }
  0x6d   :  { %479 = vmatmul.bf16.gmra.mxu2 %v868_v26  ;;  %519 = vmatmul.bf16.gmra.mxu3 %v876_v27 }
  0x7c   :  { %404 = vmatmul.bf16.gmra.mxu0 %v853_v28  ;;  %444 = vmatmul.bf16.gmra.mxu1 %v861_v29 }
  0x7d   :  { %484 = vmatmul.bf16.gmra.mxu2 %v869_v30  ;;  %524 = vmatmul.bf16.gmra.mxu3 %v877_v31 }
  0x8c   :  { %409 = vmatmul.bf16.gmra.mxu0 %v854_v32  ;;  %449 = vmatmul.bf16.gmra.mxu1 %v862_v33 }
  0x8d   :  { %489 = vmatmul.bf16.gmra.mxu2 %v870_v34  ;;  %529 = vmatmul.bf16.gmra.mxu3 %v878_v35 }
  0x9c   :  { %414 = vmatmul.bf16.gmra.mxu0 %v855_v36  ;;  %454 = vmatmul.bf16.gmra.mxu1 %v863_v37 }
  0x9d   :  { %494 = vmatmul.bf16.gmra.mxu2 %v871_v38  ;;  %534 = vmatmul.bf16.gmra.mxu3 %v879_v39 }
  0xa9   :  { %v380_v41 = vpop.f32.mrf.mxu0  ;;  %v420_v42 = vpop.f32.mrf.mxu1 }
  0xaa   :  { %v381_v43 = vadd.f32 %v1034_v40, %v380_v41  ;;  %v421_v44 = vadd.f32 %v1034_v40, %v420_v42 }
  0xac   :  { %v540_v45 = vmax.f32 %v381_v43, 0.0  ;;  %v556_v46 = vmax.f32 %v421_v44, 0.0 }
  0xae   :  { %604 = vst [vmem:[#allocation7] sm:$0xff] %v540_v45 }
  0xaf   :  { %620 = vst [vmem:[#allocation7 + $0x80] sm:$0xff] %v556_v46 }
  0xb0   :  { %v460_v47 = vpop.f32.mrf.mxu2  ;;  %v500_v48 = vpop.f32.mrf.mxu3 }
  0xb1   :  { %v461_v49 = vadd.f32 %v1034_v40, %v460_v47  ;;  %v501_v50 = vadd.f32 %v1034_v40, %v500_v48  ;;  %v382_v51 = vpop.f32.mrf.mxu0  ;;  %v422_v52 = vpop.f32.mrf.mxu1 }
  0xb2   :  { %v383_v53 = vadd.f32 %v1034_v40, %v382_v51  ;;  %v423_v54 = vadd.f32 %v1034_v40, %v422_v52 }
  0xb3   :  { %v572_v55 = vmax.f32 %v461_v49, 0.0  ;;  %v588_v56 = vmax.f32 %v501_v50, 0.0 }
  0xb4   :  { %v541_v57 = vmax.f32 %v383_v53, 0.0  ;;  %v557_v58 = vmax.f32 %v423_v54, 0.0 }
  0xb5   :  { %636 = vst [vmem:[#allocation7 + $0x100] sm:$0xff] %v572_v55 }
  0xb6   :  { %652 = vst [vmem:[#allocation7 + $0x180] sm:$0xff] %v588_v56 }
  0xb7   :  { %605 = vst [vmem:[#allocation7 + $0x8] sm:$0xff] %v541_v57 }
  0xb8   :  { %621 = vst [vmem:[#allocation7 + $0x88] sm:$0xff] %v557_v58  ;;  %v462_v59 = vpop.f32.mrf.mxu2  ;;  %v502_v60 = vpop.f32.mrf.mxu3 }
  0xb9   :  { %v463_v61 = vadd.f32 %v1034_v40, %v462_v59  ;;  %v503_v62 = vadd.f32 %v1034_v40, %v502_v60  ;;  %v385_v63 = vpop.f32.mrf.mxu0  ;;  %v425_v0 = vpop.f32.mrf.mxu1 }
  0xba   :  { %v386_v1 = vadd.f32 %v1034_v40, %v385_v63  ;;  %v426_v2 = vadd.f32 %v1034_v40, %v425_v0 }
  0xbb   :  { %v573_v3 = vmax.f32 %v463_v61, 0.0  ;;  %v589_v4 = vmax.f32 %v503_v62, 0.0 }
  0xbc   :  { %v542_v5 = vmax.f32 %v386_v1, 0.0  ;;  %v558_v6 = vmax.f32 %v426_v2, 0.0 }
  0xbd   :  { %637 = vst [vmem:[#allocation7 + $0x108] sm:$0xff] %v573_v3 }
  0xbe   :  { %653 = vst [vmem:[#allocation7 + $0x188] sm:$0xff] %v589_v4 }
  0xbf   :  { %606 = vst [vmem:[#allocation7 + $0x10] sm:$0xff] %v542_v5 }
  0xc0   :  { %622 = vst [vmem:[#allocation7 + $0x90] sm:$0xff] %v558_v6  ;;  %v465_v7 = vpop.f32.mrf.mxu2  ;;  %v505_v8 = vpop.f32.mrf.mxu3 }
  0xc1   :  { %v466_v9 = vadd.f32 %v1034_v40, %v465_v7  ;;  %v506_v10 = vadd.f32 %v1034_v40, %v505_v8  ;;  %v387_v11 = vpop.f32.mrf.mxu0  ;;  %v427_v12 = vpop.f32.mrf.mxu1 }
  0xc2   :  { %v388_v13 = vadd.f32 %v1034_v40, %v387_v11  ;;  %v428_v14 = vadd.f32 %v1034_v40, %v427_v12 }
  0xc3   :  { %v574_v15 = vmax.f32 %v466_v9, 0.0  ;;  %v590_v16 = vmax.f32 %v506_v10, 0.0 }
  0xc4   :  { %v543_v17 = vmax.f32 %v388_v13, 0.0  ;;  %v559_v18 = vmax.f32 %v428_v14, 0.0 }
  0xc5   :  { %638 = vst [vmem:[#allocation7 + $0x110] sm:$0xff] %v574_v15 }
  0xc6   :  { %654 = vst [vmem:[#allocation7 + $0x190] sm:$0xff] %v590_v16 }
  0xc7   :  { %607 = vst [vmem:[#allocation7 + $0x18] sm:$0xff] %v543_v17 }
  0xc8   :  { %623 = vst [vmem:[#allocation7 + $0x98] sm:$0xff] %v559_v18  ;;  %v467_v19 = vpop.f32.mrf.mxu2  ;;  %v507_v20 = vpop.f32.mrf.mxu3 }
  0xc9   :  { %v468_v21 = vadd.f32 %v1034_v40, %v467_v19  ;;  %v508_v22 = vadd.f32 %v1034_v40, %v507_v20  ;;  %v390_v23 = vpop.f32.mrf.mxu0  ;;  %v430_v24 = vpop.f32.mrf.mxu1 }
  0xca   :  { %v391_v25 = vadd.f32 %v1034_v40, %v390_v23  ;;  %v431_v26 = vadd.f32 %v1034_v40, %v430_v24 }
  0xcb   :  { %v575_v27 = vmax.f32 %v468_v21, 0.0  ;;  %v591_v28 = vmax.f32 %v508_v22, 0.0 }
  0xcc   :  { %v544_v29 = vmax.f32 %v391_v25, 0.0  ;;  %v560_v30 = vmax.f32 %v431_v26, 0.0 }
  0xcd   :  { %639 = vst [vmem:[#allocation7 + $0x118] sm:$0xff] %v575_v27 }
  0xce   :  { %655 = vst [vmem:[#allocation7 + $0x198] sm:$0xff] %v591_v28 }
  0xcf   :  { %608 = vst [vmem:[#allocation7 + $0x20] sm:$0xff] %v544_v29 }
  0xd0   :  { %624 = vst [vmem:[#allocation7 + $0xa0] sm:$0xff] %v560_v30  ;;  %v470_v31 = vpop.f32.mrf.mxu2  ;;  %v510_v32 = vpop.f32.mrf.mxu3 }
  0xd1   :  { %v471_v33 = vadd.f32 %v1034_v40, %v470_v31  ;;  %v511_v34 = vadd.f32 %v1034_v40, %v510_v32  ;;  %v392_v35 = vpop.f32.mrf.mxu0  ;;  %v432_v36 = vpop.f32.mrf.mxu1 }
  0xd2   :  { %v393_v37 = vadd.f32 %v1034_v40, %v392_v35  ;;  %v433_v38 = vadd.f32 %v1034_v40, %v432_v36 }
  0xd3   :  { %v576_v39 = vmax.f32 %v471_v33, 0.0  ;;  %v592_v41 = vmax.f32 %v511_v34, 0.0 }
  0xd4   :  { %v545_v42 = vmax.f32 %v393_v37, 0.0  ;;  %v561_v43 = vmax.f32 %v433_v38, 0.0 }
  0xd5   :  { %640 = vst [vmem:[#allocation7 + $0x120] sm:$0xff] %v576_v39 }
  0xd6   :  { %656 = vst [vmem:[#allocation7 + $0x1a0] sm:$0xff] %v592_v41 }
  0xd7   :  { %609 = vst [vmem:[#allocation7 + $0x28] sm:$0xff] %v545_v42 }
  0xd8   :  { %625 = vst [vmem:[#allocation7 + $0xa8] sm:$0xff] %v561_v43  ;;  %v472_v44 = vpop.f32.mrf.mxu2  ;;  %v512_v45 = vpop.f32.mrf.mxu3 }
  0xd9   :  { %v473_v46 = vadd.f32 %v1034_v40, %v472_v44  ;;  %v513_v47 = vadd.f32 %v1034_v40, %v512_v45  ;;  %v395_v48 = vpop.f32.mrf.mxu0  ;;  %v435_v49 = vpop.f32.mrf.mxu1 }
  0xda   :  { %v396_v50 = vadd.f32 %v1034_v40, %v395_v48  ;;  %v436_v51 = vadd.f32 %v1034_v40, %v435_v49 }
  0xdb   :  { %v577_v52 = vmax.f32 %v473_v46, 0.0  ;;  %v593_v53 = vmax.f32 %v513_v47, 0.0 }
  0xdc   :  { %v546_v54 = vmax.f32 %v396_v50, 0.0  ;;  %v562_v55 = vmax.f32 %v436_v51, 0.0 }
  0xdd   :  { %641 = vst [vmem:[#allocation7 + $0x128] sm:$0xff] %v577_v52 }
  0xde   :  { %657 = vst [vmem:[#allocation7 + $0x1a8] sm:$0xff] %v593_v53 }
  0xdf   :  { %610 = vst [vmem:[#allocation7 + $0x30] sm:$0xff] %v546_v54 }
  0xe0   :  { %626 = vst [vmem:[#allocation7 + $0xb0] sm:$0xff] %v562_v55  ;;  %v475_v56 = vpop.f32.mrf.mxu2  ;;  %v515_v57 = vpop.f32.mrf.mxu3 }
  0xe1   :  { %v476_v58 = vadd.f32 %v1034_v40, %v475_v56  ;;  %v516_v59 = vadd.f32 %v1034_v40, %v515_v57  ;;  %v397_v60 = vpop.f32.mrf.mxu0  ;;  %v437_v61 = vpop.f32.mrf.mxu1 }
  0xe2   :  { %v398_v62 = vadd.f32 %v1034_v40, %v397_v60  ;;  %v438_v63 = vadd.f32 %v1034_v40, %v437_v61 }
  0xe3   :  { %v578_v0 = vmax.f32 %v476_v58, 0.0  ;;  %v594_v1 = vmax.f32 %v516_v59, 0.0 }
  0xe4   :  { %v547_v2 = vmax.f32 %v398_v62, 0.0  ;;  %v563_v3 = vmax.f32 %v438_v63, 0.0 }
  0xe5   :  { %642 = vst [vmem:[#allocation7 + $0x130] sm:$0xff] %v578_v0 }
  0xe6   :  { %658 = vst [vmem:[#allocation7 + $0x1b0] sm:$0xff] %v594_v1 }
  0xe7   :  { %611 = vst [vmem:[#allocation7 + $0x38] sm:$0xff] %v547_v2 }
  0xe8   :  { %627 = vst [vmem:[#allocation7 + $0xb8] sm:$0xff] %v563_v3  ;;  %v477_v4 = vpop.f32.mrf.mxu2  ;;  %v517_v5 = vpop.f32.mrf.mxu3 }
  0xe9   :  { %v478_v6 = vadd.f32 %v1034_v40, %v477_v4  ;;  %v518_v7 = vadd.f32 %v1034_v40, %v517_v5  ;;  %v400_v8 = vpop.f32.mrf.mxu0  ;;  %v440_v9 = vpop.f32.mrf.mxu1 }
  0xea   :  { %v401_v10 = vadd.f32 %v1034_v40, %v400_v8  ;;  %v441_v11 = vadd.f32 %v1034_v40, %v440_v9 }
  0xeb   :  { %v579_v12 = vmax.f32 %v478_v6, 0.0  ;;  %v595_v13 = vmax.f32 %v518_v7, 0.0 }
  0xec   :  { %v548_v14 = vmax.f32 %v401_v10, 0.0  ;;  %v564_v15 = vmax.f32 %v441_v11, 0.0 }
  0xed   :  { %643 = vst [vmem:[#allocation7 + $0x138] sm:$0xff] %v579_v12 }
  0xee   :  { %659 = vst [vmem:[#allocation7 + $0x1b8] sm:$0xff] %v595_v13 }
  0xef   :  { %612 = vst [vmem:[#allocation7 + $0x40] sm:$0xff] %v548_v14 }
  0xf0   :  { %628 = vst [vmem:[#allocation7 + $0xc0] sm:$0xff] %v564_v15  ;;  %v480_v16 = vpop.f32.mrf.mxu2  ;;  %v520_v17 = vpop.f32.mrf.mxu3 }
  0xf1   :  { %v481_v18 = vadd.f32 %v1034_v40, %v480_v16  ;;  %v521_v19 = vadd.f32 %v1034_v40, %v520_v17  ;;  %v402_v20 = vpop.f32.mrf.mxu0  ;;  %v442_v21 = vpop.f32.mrf.mxu1 }
  0xf2   :  { %v403_v22 = vadd.f32 %v1034_v40, %v402_v20  ;;  %v443_v23 = vadd.f32 %v1034_v40, %v442_v21 }
  0xf3   :  { %v580_v24 = vmax.f32 %v481_v18, 0.0  ;;  %v596_v25 = vmax.f32 %v521_v19, 0.0 }
  0xf4   :  { %v549_v26 = vmax.f32 %v403_v22, 0.0  ;;  %v565_v27 = vmax.f32 %v443_v23, 0.0 }
  0xf5   :  { %644 = vst [vmem:[#allocation7 + $0x140] sm:$0xff] %v580_v24 }
  0xf6   :  { %660 = vst [vmem:[#allocation7 + $0x1c0] sm:$0xff] %v596_v25 }
  0xf7   :  { %613 = vst [vmem:[#allocation7 + $0x48] sm:$0xff] %v549_v26 }
  0xf8   :  { %629 = vst [vmem:[#allocation7 + $0xc8] sm:$0xff] %v565_v27  ;;  %v482_v28 = vpop.f32.mrf.mxu2  ;;  %v522_v29 = vpop.f32.mrf.mxu3 }
  0xf9   :  { %v483_v30 = vadd.f32 %v1034_v40, %v482_v28  ;;  %v523_v31 = vadd.f32 %v1034_v40, %v522_v29  ;;  %v405_v32 = vpop.f32.mrf.mxu0  ;;  %v445_v33 = vpop.f32.mrf.mxu1 }
  0xfa   :  { %v406_v34 = vadd.f32 %v1034_v40, %v405_v32  ;;  %v446_v35 = vadd.f32 %v1034_v40, %v445_v33 }
  0xfb   :  { %v581_v36 = vmax.f32 %v483_v30, 0.0  ;;  %v597_v37 = vmax.f32 %v523_v31, 0.0 }
  0xfc   :  { %v550_v38 = vmax.f32 %v406_v34, 0.0  ;;  %v566_v39 = vmax.f32 %v446_v35, 0.0 }
  0xfd   :  { %645 = vst [vmem:[#allocation7 + $0x148] sm:$0xff] %v581_v36 }
  0xfe   :  { %661 = vst [vmem:[#allocation7 + $0x1c8] sm:$0xff] %v597_v37 }
  0xff   :  { %614 = vst [vmem:[#allocation7 + $0x50] sm:$0xff] %v550_v38 }
 0x100   :  { %630 = vst [vmem:[#allocation7 + $0xd0] sm:$0xff] %v566_v39  ;;  %v485_v41 = vpop.f32.mrf.mxu2  ;;  %v525_v42 = vpop.f32.mrf.mxu3 }
 0x101   :  { %v486_v43 = vadd.f32 %v1034_v40, %v485_v41  ;;  %v526_v44 = vadd.f32 %v1034_v40, %v525_v42  ;;  %v407_v45 = vpop.f32.mrf.mxu0  ;;  %v447_v46 = vpop.f32.mrf.mxu1 }
 0x102   :  { %v408_v47 = vadd.f32 %v1034_v40, %v407_v45  ;;  %v448_v48 = vadd.f32 %v1034_v40, %v447_v46 }
 0x103   :  { %v582_v49 = vmax.f32 %v486_v43, 0.0  ;;  %v598_v50 = vmax.f32 %v526_v44, 0.0 }
 0x104   :  { %v551_v51 = vmax.f32 %v408_v47, 0.0  ;;  %v567_v52 = vmax.f32 %v448_v48, 0.0 }
 0x105   :  { %646 = vst [vmem:[#allocation7 + $0x150] sm:$0xff] %v582_v49 }
 0x106   :  { %662 = vst [vmem:[#allocation7 + $0x1d0] sm:$0xff] %v598_v50 }
 0x107   :  { %615 = vst [vmem:[#allocation7 + $0x58] sm:$0xff] %v551_v51 }
 0x108   :  { %631 = vst [vmem:[#allocation7 + $0xd8] sm:$0xff] %v567_v52  ;;  %v487_v53 = vpop.f32.mrf.mxu2  ;;  %v527_v54 = vpop.f32.mrf.mxu3 }
 0x109   :  { %v488_v55 = vadd.f32 %v1034_v40, %v487_v53  ;;  %v528_v56 = vadd.f32 %v1034_v40, %v527_v54  ;;  %v410_v57 = vpop.f32.mrf.mxu0  ;;  %v450_v58 = vpop.f32.mrf.mxu1 }
 0x10a   :  { %v411_v59 = vadd.f32 %v1034_v40, %v410_v57  ;;  %v451_v60 = vadd.f32 %v1034_v40, %v450_v58 }
 0x10b   :  { %v583_v61 = vmax.f32 %v488_v55, 0.0  ;;  %v599_v62 = vmax.f32 %v528_v56, 0.0 }
 0x10c   :  { %v552_v63 = vmax.f32 %v411_v59, 0.0  ;;  %v568_v0 = vmax.f32 %v451_v60, 0.0 }
 0x10d   :  { %647 = vst [vmem:[#allocation7 + $0x158] sm:$0xff] %v583_v61 }
 0x10e   :  { %663 = vst [vmem:[#allocation7 + $0x1d8] sm:$0xff] %v599_v62 }
 0x10f   :  { %616 = vst [vmem:[#allocation7 + $0x60] sm:$0xff] %v552_v63 }
 0x110   :  { %632 = vst [vmem:[#allocation7 + $0xe0] sm:$0xff] %v568_v0  ;;  %v490_v1 = vpop.f32.mrf.mxu2  ;;  %v530_v2 = vpop.f32.mrf.mxu3 }
 0x111   :  { %v491_v3 = vadd.f32 %v1034_v40, %v490_v1  ;;  %v531_v4 = vadd.f32 %v1034_v40, %v530_v2  ;;  %v412_v5 = vpop.f32.mrf.mxu0  ;;  %v452_v6 = vpop.f32.mrf.mxu1 }
 0x112   :  { %v413_v7 = vadd.f32 %v1034_v40, %v412_v5  ;;  %v453_v8 = vadd.f32 %v1034_v40, %v452_v6 }
 0x113   :  { %v584_v9 = vmax.f32 %v491_v3, 0.0  ;;  %v600_v10 = vmax.f32 %v531_v4, 0.0 }
 0x114   :  { %v553_v11 = vmax.f32 %v413_v7, 0.0  ;;  %v569_v12 = vmax.f32 %v453_v8, 0.0 }
 0x115   :  { %648 = vst [vmem:[#allocation7 + $0x160] sm:$0xff] %v584_v9 }
 0x116   :  { %664 = vst [vmem:[#allocation7 + $0x1e0] sm:$0xff] %v600_v10 }
 0x117   :  { %617 = vst [vmem:[#allocation7 + $0x68] sm:$0xff] %v553_v11 }
 0x118   :  { %633 = vst [vmem:[#allocation7 + $0xe8] sm:$0xff] %v569_v12  ;;  %v492_v13 = vpop.f32.mrf.mxu2  ;;  %v532_v14 = vpop.f32.mrf.mxu3 }
 0x119   :  { %v493_v15 = vadd.f32 %v1034_v40, %v492_v13  ;;  %v533_v16 = vadd.f32 %v1034_v40, %v532_v14  ;;  %v415_v17 = vpop.f32.mrf.mxu0  ;;  %v455_v18 = vpop.f32.mrf.mxu1 }
 0x11a   :  { %v416_v19 = vadd.f32 %v1034_v40, %v415_v17  ;;  %v456_v20 = vadd.f32 %v1034_v40, %v455_v18 }
 0x11b   :  { %v585_v21 = vmax.f32 %v493_v15, 0.0  ;;  %v601_v22 = vmax.f32 %v533_v16, 0.0 }
 0x11c   :  { %v554_v23 = vmax.f32 %v416_v19, 0.0  ;;  %v570_v24 = vmax.f32 %v456_v20, 0.0 }
 0x11d   :  { %649 = vst [vmem:[#allocation7 + $0x168] sm:$0xff] %v585_v21 }
 0x11e   :  { %665 = vst [vmem:[#allocation7 + $0x1e8] sm:$0xff] %v601_v22 }
 0x11f   :  { %618 = vst [vmem:[#allocation7 + $0x70] sm:$0xff] %v554_v23 }
 0x120   :  { %634 = vst [vmem:[#allocation7 + $0xf0] sm:$0xff] %v570_v24  ;;  %v495_v25 = vpop.f32.mrf.mxu2  ;;  %v535_v26 = vpop.f32.mrf.mxu3 }
 0x121   :  { %v496_v27 = vadd.f32 %v1034_v40, %v495_v25  ;;  %v536_v28 = vadd.f32 %v1034_v40, %v535_v26  ;;  %v417_v29 = vpop.f32.mrf.mxu0  ;;  %v457_v30 = vpop.f32.mrf.mxu1 }
 0x122   :  { %v418_v31 = vadd.f32 %v1034_v40, %v417_v29  ;;  %v458_v32 = vadd.f32 %v1034_v40, %v457_v30 }
 0x123   :  { %v586_v33 = vmax.f32 %v496_v27, 0.0  ;;  %v602_v34 = vmax.f32 %v536_v28, 0.0 }
 0x124   :  { %v555_v35 = vmax.f32 %v418_v31, 0.0  ;;  %v571_v36 = vmax.f32 %v458_v32, 0.0 }
 0x125   :  { %650 = vst [vmem:[#allocation7 + $0x170] sm:$0xff] %v586_v33 }
 0x126   :  { %666 = vst [vmem:[#allocation7 + $0x1f0] sm:$0xff] %v602_v34 }
 0x127   :  { %619 = vst [vmem:[#allocation7 + $0x78] sm:$0xff] %v555_v35 }
 0x128   :  { %635 = vst [vmem:[#allocation7 + $0xf8] sm:$0xff] %v571_v36  ;;  %v497_v37 = vpop.f32.mrf.mxu2  ;;  %v537_v38 = vpop.f32.mrf.mxu3 }
 0x129   :  { %v498_v39 = vadd.f32 %v1034_v40, %v497_v37  ;;  %v538_v41 = vadd.f32 %v1034_v40, %v537_v38 }
 0x12b   :  { %v587_v42 = vmax.f32 %v498_v39, 0.0  ;;  %v603_v43 = vmax.f32 %v538_v41, 0.0 }
 0x12d   :  { %651 = vst [vmem:[#allocation7 + $0x178] sm:$0xff] %v587_v42 }
 0x12e   :  { %667 = vst [vmem:[#allocation7 + $0x1f8] sm:$0xff] %v603_v43 }
 0x12f   :  { %680 = dma.vmem_to_hbm [thread:$0]  %s673_s24, 8192, %s675_s27, [#allocation4], %s1003_s28, %s1003_s28, %s1004_s29  }
 0x130   :  { %996 = dma.done.wait [#allocation4], 8192  }
 0x131   :  { %997 = vsyncadd [#allocation4], 4294959104 }
 0x132   :  { %685 = vsyncpa [#allocation3], 1 }
 0x133   :  { %686 = vsyncpa [#allocation6], 1 }
 0x134   :  { %687 = vsyncpa [#allocation4], 1 }

</bundles_post_ra>
